<compile_context>
chip_gen: v6e
topology: v6e:2x2x1
jax: 0.10.0
libtpu: 0.0.40
codegen_flags: <defaults>
</compile_context>

<pallas_src>
import functools
import math

import jax
import jax.numpy as jnp
from jax import lax
from jax.experimental import pallas as pl
from jax.experimental.pallas import tpu as pltpu

_LN_EPS = 1e-5


def _patch_merging_kernel(x_ref, we_ref, wo_ref, wsum_ref, bias_ref, o_ref):
    """Fused 2x2 gather + LayerNorm(4C) + Linear(4C->2C) on one token tile.

    x_ref:    (TR, 2, W2, 2C)  TR row-pairs of the (reshaped) input feature map.
    we_ref:   (2C, 2Co) bf16   gamma-folded weight rows for the even input row
                               (token channel order [x0 | x2]).
    wo_ref:   (2C, 2Co) bf16   gamma-folded weight rows for the odd input row
                               (token channel order [x1 | x3]).
    wsum_ref: (1, 2Co)  f32    column sums of the bf16 gamma*W actually used.
    bias_ref: (1, 2Co)  f32    beta @ W.
    o_ref:    (TR*W2, 2Co)     merged-token outputs.
    """
    tr, _, w2, c2in = x_ref.shape
    ntok = tr * w2
    inv_c4 = 1.0 / (2 * c2in)  # 1 / (4*C)
    f32 = jnp.float32

    x = x_ref[...]
    # Even / odd input rows, merged (row-pair, W2) -> tokens.  The sublane-merge
    # reshape is a pure layout no-op when W2 is a multiple of the sublane
    # packing (8 for f32, 16 for bf16); otherwise Mosaic emits an in-VMEM
    # repack (correct, just slower).
    xe = x[:, 0].reshape(ntok, c2in)   # channels [x0 | x2], input dtype
    xo = x[:, 1].reshape(ntok, c2in)   # channels [x1 | x3], input dtype

    # Single-pass LayerNorm statistics over the full 4C channels, in f32.
    # The f32 upcasts are consumed only by these reductions, so no full-tile
    # f32 copy stays live across the MXU matmuls below.
    def _sums(v):
        v32 = v.astype(f32)
        return (jnp.sum(v32, axis=-1, keepdims=True),
                jnp.sum(v32 * v32, axis=-1, keepdims=True))

    se, sse = _sums(xe)
    so, sso = _sums(xo)
    mean = (se + so) * inv_c4
    var = jnp.maximum((sse + sso) * inv_c4 - mean * mean, 0.0)
    inv = lax.rsqrt(var + _LN_EPS)                           # (ntok, 1)

    # Projection on the MXU: bf16 operands, f32 accumulation (gamma already
    # folded into we/wo).  Two K=2C dots instead of one K=4C dot avoids
    # materializing the concatenated tokens; on v6e/v7x (256-wide MXU) the
    # K-padding cost is identical either way.
    mxu_dt = we_ref.dtype
    acc = jnp.dot(xe.astype(mxu_dt), we_ref[...], preferred_element_type=f32)
    acc = acc + jnp.dot(xo.astype(mxu_dt), wo_ref[...], preferred_element_type=f32)

    out = acc * inv - (inv * mean) * wsum_ref[...] + bias_ref[...]
    o_ref[...] = out.astype(o_ref.dtype)


@functools.lru_cache(maxsize=1)
def _vmem_capacity_bytes():
    """Per-core VMEM capacity; conservative 64 MiB (v7x) fallback."""
    try:
        cap = getattr(pltpu.get_tpu_info(), "vmem_capacity_bytes", None)
        if cap:
            return int(cap)
    except Exception:
        pass
    return 64 << 20


def _pick_tile_rows(n_rows, w2, c4, itemsize, *, target_tokens, max_tile_bytes):
    """Row-pairs per grid step: big enough to feed the DMA pipeline / HBM
    roofline, small enough to double-buffer comfortably within the chip's
    VMEM, and split into >= 2 grid steps so v7x's two TensorCores both work."""
    bytes_per_row = max(1, w2 * c4 * itemsize)
    tr = max(1, target_tokens // max(1, w2))
    tr = min(tr, max(1, max_tile_bytes // bytes_per_row))
    # Keep (tr * W2) — the output block's sublane extent — a multiple of 32 so
    # the minor-dim divisibility rule holds for every dtype packing.
    m = 32 // math.gcd(w2, 32)
    if tr >= n_rows:
        # Whole map fits in one tile: still split into two grid steps when the
        # alignment allows it, so the "parallel" axis can shard across cores.
        if n_rows > m:
            tr = max(m, (((n_rows + 1) // 2) // m) * m)
            if tr >= n_rows:
                tr = n_rows
        else:
            tr = n_rows
        return tr
    tr = max(m, (tr // m) * m)
    return min(tr, n_rows)


def patch_merging_forward(x, gamma, beta, w):
    """JAX/Pallas equivalent of PatchMerging.forward.

    Args:
      x:     (B, D, H, W, C) feature map (float32 or bfloat16).
      gamma: (4C,)  LayerNorm weight.
      beta:  (4C,)  LayerNorm bias.
      w:     (4C, 2C) reduction weight (transpose of the PyTorch Linear weight,
             so the projection is y @ w).
    Returns:
      (B, D, ceil(H/2), ceil(W/2), 2C) array with x.dtype.
    """
    B, D, H, W, C = x.shape
    pad_h, pad_w = H % 2, W % 2
    if pad_h or pad_w:
        x = jnp.pad(x, ((0, 0), (0, 0), (0, pad_h), (0, pad_w), (0, 0)))
        H, W = H + pad_h, W + pad_w
    H2, W2 = H // 2, W // 2
    c4 = 4 * C
    c2 = w.shape[1]

    # Fold the LayerNorm affine transform into the projection (exact algebra):
    #   ((x - mu)*inv*gamma + beta) @ W
    #     = inv*(x @ (gamma*W)) - inv*mu*colsum(gamma*W) + beta @ W
    f32 = jnp.float32
    wg = gamma.astype(f32)[:, None] * w.astype(f32)              # (4C, 2C)
    bias = jnp.dot(beta.astype(f32), w.astype(f32),
                   precision=lax.Precision.HIGHEST).reshape(1, c2)
    # Reference channel order is [x0, x1, x2, x3]; the kernel sees [x0 | x2]
    # on the even input row and [x1 | x3] on the odd one, so split/permute the
    # weight rows.  MXU operands are bf16 (f32 accumulation); compute the
    # mean-correction column sums from the *rounded* weights so the fold stays
    # exact w.r.t. the matmul actually performed.
    we = jnp.concatenate([wg[0:C], wg[2 * C:3 * C]], axis=0).astype(jnp.bfloat16)
    wo = jnp.concatenate([wg[C:2 * C], wg[3 * C:4 * C]], axis=0).astype(jnp.bfloat16)
    wsum = (jnp.sum(we.astype(f32), axis=0)
            + jnp.sum(wo.astype(f32), axis=0)).reshape(1, c2)

    # Free (contiguous) reshape: no gathered copy of the activations in HBM.
    n_rows = B * D * H2
    xr = x.reshape(n_rows, 2, W2, 2 * C)

    itemsize = jnp.dtype(x.dtype).itemsize
    vmem_cap = _vmem_capacity_bytes()
    if vmem_cap >= (96 << 20):        # v5e / v6e: 128 MiB physical VMEM
        target_tokens, max_tile_bytes = 8192, 16 << 20
    else:                             # v7x: 64 MiB per TensorCore
        target_tokens, max_tile_bytes = 4096, 6 << 20
    tr = _pick_tile_rows(n_rows, W2, c4, itemsize,
                         target_tokens=target_tokens,
                         max_tile_bytes=max_tile_bytes)
    grid = pl.cdiv(n_rows, tr)
    n_tok_blk = tr * W2
    n_tokens = n_rows * W2

    in_tile = tr * 2 * W2 * 2 * C * itemsize
    out_tile = n_tok_blk * c2 * itemsize
    weight_bytes = 2 * (2 * C) * c2 * 2 + 2 * c2 * 4            # bf16 we/wo + f32 wsum/bias
    # Budget: double-buffered I/O + (2x-buffered) weights + in-kernel temps
    # (bf16 MXU operand copies, f32 stat temporaries, f32 accumulator) + margin.
    temps = n_tok_blk * (2 * C) * 8 + n_tok_blk * c2 * 4
    need = 2 * (in_tile + out_tile) + 2 * weight_bytes + temps + (4 << 20)
    vmem_limit = int(min(int(0.75 * vmem_cap), max(32 << 20, need)))

    cost = pl.CostEstimate(
        flops=2 * n_tokens * c4 * c2,
        transcendentals=n_tokens,
        bytes_accessed=n_tokens * (c4 + c2) * itemsize + 2 * c4 * c2 * 2,
    )

    # NOTE: for real video-Swin dims (C >= 96) the 2C output is lane-dense
    # (>= 128); at the toy C=32 demo size stores are half-width, which is fine.
    out = pl.pallas_call(
        _patch_merging_kernel,
        out_shape=jax.ShapeDtypeStruct((n_tokens, c2), x.dtype),
        grid_spec=pltpu.PrefetchScalarGridSpec(
            num_scalar_prefetch=0,
            grid=(grid,),
            in_specs=[
                pl.BlockSpec((tr, 2, W2, 2 * C), lambda i: (i, 0, 0, 0)),
                pl.BlockSpec((2 * C, c2), lambda i: (0, 0)),
                pl.BlockSpec((2 * C, c2), lambda i: (0, 0)),
                pl.BlockSpec((1, c2), lambda i: (0, 0)),
                pl.BlockSpec((1, c2), lambda i: (0, 0)),
            ],
            out_specs=pl.BlockSpec((n_tok_blk, c2), lambda i: (i, 0)),
        ),
        compiler_params=pltpu.CompilerParams(
            dimension_semantics=("parallel",),
            vmem_limit_bytes=vmem_limit,
        ),
        cost_estimate=cost,
    )(xr, we, wo, wsum, bias)

    return out.reshape(B, D, H2, W2, c2)


def _reference(x, gamma, beta, w):
    """Pure-JAX reference for correctness checking."""
    B, D, H, W, C = x.shape
    pad_h, pad_w = H % 2, W % 2
    if pad_h or pad_w:
        x = jnp.pad(x, ((0, 0), (0, 0), (0, pad_h), (0, pad_w), (0, 0)))
    x0 = x[:, :, 0::2, 0::2, :]
    x1 = x[:, :, 1::2, 0::2, :]
    x2 = x[:, :, 0::2, 1::2, :]
    x3 = x[:, :, 1::2, 1::2, :]
    xc = jnp.concatenate([x0, x1, x2, x3], axis=-1).astype(jnp.float32)
    mean = jnp.mean(xc, axis=-1, keepdims=True)
    var = jnp.mean((xc - mean) ** 2, axis=-1, keepdims=True)
    y = (xc - mean) * lax.rsqrt(var + _LN_EPS) * gamma + beta
    return jnp.einsum("bdhwc,co->bdhwo", y, w,
                      precision=lax.Precision.HIGHEST)


if __name__ == "__main__":
    # Small shapes consistent with the module: dim (C) = 32 so 4C = 128,
    # 2C = 64; W2 = 8 keeps the in-kernel token-merge reshape a layout no-op
    # for the f32 activation path.
    B, D, H, W, C = 2, 2, 16, 16, 32

    key = jax.random.PRNGKey(0)
    kx, kg, kb, kw = jax.random.split(key, 4)

    x = jax.random.normal(kx, (B, D, H, W, C), dtype=jnp.float32)
    gamma = 1.0 + 0.1 * jax.random.normal(kg, (4 * C,), dtype=jnp.float32)
    beta = 0.1 * jax.random.normal(kb, (4 * C,), dtype=jnp.float32)
    w = jax.random.normal(kw, (4 * C, 2 * C), dtype=jnp.float32) * (1.0 / (4 * C) ** 0.5)

    fwd = jax.jit(patch_merging_forward)

    # float32 activations (MXU operands are cast down to bf16 inside the
    # kernel; LN stats and accumulation stay f32, hence the looser tolerance
    # vs. the Precision.HIGHEST reference).
    out = jax.block_until_ready(fwd(x, gamma, beta, w))
    ref = jax.block_until_ready(_reference(x, gamma, beta, w))
    assert out.shape == (B, D, H // 2, W // 2, 2 * C), out.shape
    err = float(jnp.max(jnp.abs(out - ref)))
    assert err < 5e-2, f"f32 max abs err {err}"

    # bfloat16 activations (half the HBM traffic; stats/accum still f32 inside).
    x_bf = x.astype(jnp.bfloat16)
    out_bf = jax.block_until_ready(fwd(x_bf, gamma, beta, w))
    ref_bf = _reference(x_bf.astype(jnp.float32), gamma, beta, w)
    err_bf = float(jnp.max(jnp.abs(out_bf.astype(jnp.float32) - ref_bf)))
    assert out_bf.dtype == jnp.bfloat16, out_bf.dtype
    assert err_bf < 1.5e-1, f"bf16 max abs err {err_bf}"

    print("KERNEL_OK")
</pallas_src>

<mosaic_0001>
module attributes {stable_mosaic.version = 11 : i64} {
  func.func @_patch_merging_kernel(%arg0: i32, %arg1: memref<16x2x8x64xf32, #tpu.memory_space<vmem>>, %arg2: memref<64x64xbf16, #tpu.memory_space<vmem>>, %arg3: memref<64x64xbf16, #tpu.memory_space<vmem>>, %arg4: memref<1x64xf32, #tpu.memory_space<vmem>>, %arg5: memref<1x64xf32, #tpu.memory_space<vmem>>, %arg6: memref<128x64xf32, #tpu.memory_space<vmem>>) attributes {dimension_semantics = [#tpu.dimension_semantics<parallel>], iteration_bounds = array<i64: 2>, scalar_prefetch = 0 : i64, scratch_operands = 0 : i64, tpu.core_type = #tpu.core_type<tc>, window_params = [{transform_indices = @transform_0, window_bounds = array<i64: 16, 2, 8, 64>}, {pipeline_mode = #tpu.pipeline_mode<synchronous>, transform_indices = @transform_1, window_bounds = array<i64: 64, 64>}, {pipeline_mode = #tpu.pipeline_mode<synchronous>, transform_indices = @transform_2, window_bounds = array<i64: 64, 64>}, {pipeline_mode = #tpu.pipeline_mode<synchronous>, transform_indices = @transform_3, window_bounds = array<i64: 1, 64>}, {pipeline_mode = #tpu.pipeline_mode<synchronous>, transform_indices = @transform_4, window_bounds = array<i64: 1, 64>}, {transform_indices = @transform_5, window_bounds = array<i64: 128, 64>}]} {
    %c0 = arith.constant 0 : index
    %c0_0 = arith.constant 0 : index
    %c0_1 = arith.constant 0 : index
    %c0_2 = arith.constant 0 : index
    %0 = vector.load %arg1[%c0, %c0_0, %c0_1, %c0_2] : memref<16x2x8x64xf32, #tpu.memory_space<vmem>>, vector<16x2x8x64xf32>
    %1 = vector.extract_strided_slice %0 {offsets = [0, 0, 0, 0], sizes = [16, 1, 8, 64], strides = [1, 1, 1, 1]} : vector<16x2x8x64xf32> to vector<16x1x8x64xf32>
    %2 = vector.shape_cast %1 : vector<16x1x8x64xf32> to vector<16x8x64xf32>
    %3 = vector.shape_cast %2 : vector<16x8x64xf32> to vector<128x64xf32>
    %4 = vector.extract_strided_slice %0 {offsets = [0, 1, 0, 0], sizes = [16, 1, 8, 64], strides = [1, 1, 1, 1]} : vector<16x2x8x64xf32> to vector<16x1x8x64xf32>
    %5 = vector.shape_cast %4 : vector<16x1x8x64xf32> to vector<16x8x64xf32>
    %6 = vector.shape_cast %5 : vector<16x8x64xf32> to vector<128x64xf32>
    %cst = arith.constant dense<0.000000e+00> : vector<128xf32>
    %7 = vector.multi_reduction <add>, %3, %cst [1] : vector<128x64xf32> to vector<128xf32>
    %8 = vector.shape_cast %7 : vector<128xf32> to vector<128x1xf32>
    %9 = arith.mulf %3, %3 : vector<128x64xf32>
    %cst_3 = arith.constant dense<0.000000e+00> : vector<128xf32>
    %10 = vector.multi_reduction <add>, %9, %cst_3 [1] : vector<128x64xf32> to vector<128xf32>
    %11 = vector.shape_cast %10 : vector<128xf32> to vector<128x1xf32>
    %cst_4 = arith.constant dense<0.000000e+00> : vector<128xf32>
    %12 = vector.multi_reduction <add>, %6, %cst_4 [1] : vector<128x64xf32> to vector<128xf32>
    %13 = vector.shape_cast %12 : vector<128xf32> to vector<128x1xf32>
    %14 = arith.mulf %6, %6 : vector<128x64xf32>
    %cst_5 = arith.constant dense<0.000000e+00> : vector<128xf32>
    %15 = vector.multi_reduction <add>, %14, %cst_5 [1] : vector<128x64xf32> to vector<128xf32>
    %16 = vector.shape_cast %15 : vector<128xf32> to vector<128x1xf32>
    %17 = arith.addf %8, %13 : vector<128x1xf32>
    %cst_6 = arith.constant 7.812500e-03 : f32
    %18 = vector.broadcast %cst_6 : f32 to vector<128x1xf32>
    %19 = arith.mulf %17, %18 : vector<128x1xf32>
    %20 = arith.addf %11, %16 : vector<128x1xf32>
    %cst_7 = arith.constant 7.812500e-03 : f32
    %21 = vector.broadcast %cst_7 : f32 to vector<128x1xf32>
    %22 = arith.mulf %20, %21 : vector<128x1xf32>
    %23 = arith.mulf %19, %19 : vector<128x1xf32>
    %24 = arith.subf %22, %23 : vector<128x1xf32>
    %cst_8 = arith.constant 0.000000e+00 : f32
    %25 = vector.broadcast %cst_8 : f32 to vector<128x1xf32>
    %26 = arith.maximumf %24, %25 : vector<128x1xf32>
    %cst_9 = arith.constant 9.99999974E-6 : f32
    %27 = vector.broadcast %cst_9 : f32 to vector<128x1xf32>
    %28 = arith.addf %26, %27 : vector<128x1xf32>
    %29 = math.rsqrt %28 : vector<128x1xf32>
    %30 = arith.truncf %3 : vector<128x64xf32> to vector<128x64xbf16>
    %c0_10 = arith.constant 0 : index
    %c0_11 = arith.constant 0 : index
    %31 = vector.load %arg2[%c0_10, %c0_11] : memref<64x64xbf16, #tpu.memory_space<vmem>>, vector<64x64xbf16>
    %cst_12 = arith.constant dense<0.000000e+00> : vector<128x64xf32>
    %32 = tpu.matmul %30, %31, %cst_12 {dimension_numbers = #tpu.dot_dimension_numbers<[1], [0], [0], [1], [0, 0, 1, 1], [], []>} : vector<128x64xbf16>, vector<64x64xbf16>, vector<128x64xf32> -> vector<128x64xf32>
    %33 = arith.truncf %6 : vector<128x64xf32> to vector<128x64xbf16>
    %c0_13 = arith.constant 0 : index
    %c0_14 = arith.constant 0 : index
    %34 = vector.load %arg3[%c0_13, %c0_14] : memref<64x64xbf16, #tpu.memory_space<vmem>>, vector<64x64xbf16>
    %cst_15 = arith.constant dense<0.000000e+00> : vector<128x64xf32>
    %35 = tpu.matmul %33, %34, %cst_15 {dimension_numbers = #tpu.dot_dimension_numbers<[1], [0], [0], [1], [0, 0, 1, 1], [], []>} : vector<128x64xbf16>, vector<64x64xbf16>, vector<128x64xf32> -> vector<128x64xf32>
    %36 = arith.addf %32, %35 : vector<128x64xf32>
    %37 = vector.broadcast %29 : vector<128x1xf32> to vector<128x64xf32>
    %38 = arith.mulf %36, %37 : vector<128x64xf32>
    %39 = arith.mulf %29, %19 : vector<128x1xf32>
    %c0_16 = arith.constant 0 : index
    %c0_17 = arith.constant 0 : index
    %40 = vector.load %arg4[%c0_16, %c0_17] : memref<1x64xf32, #tpu.memory_space<vmem>>, vector<1x64xf32>
    %41 = vector.broadcast %39 : vector<128x1xf32> to vector<128x64xf32>
    %42 = vector.broadcast %40 : vector<1x64xf32> to vector<128x64xf32>
    %43 = arith.mulf %41, %42 : vector<128x64xf32>
    %44 = arith.subf %38, %43 : vector<128x64xf32>
    %c0_18 = arith.constant 0 : index
    %c0_19 = arith.constant 0 : index
    %45 = vector.load %arg5[%c0_18, %c0_19] : memref<1x64xf32, #tpu.memory_space<vmem>>, vector<1x64xf32>
    %46 = vector.broadcast %45 : vector<1x64xf32> to vector<128x64xf32>
    %47 = arith.addf %44, %46 : vector<128x64xf32>
    %c0_20 = arith.constant 0 : index
    %c0_21 = arith.constant 0 : index
    %48 = vector.load %arg6[%c0_20, %c0_21] : memref<128x64xf32, #tpu.memory_space<vmem>>, vector<128x64xf32>
    tpu.vector_store %arg6[%c0_20, %c0_21], %47 {strides = array<i32>} : memref<128x64xf32, #tpu.memory_space<vmem>>, vector<128x64xf32>,
    return
  }
  func.func @transform_0(%arg0: i32) -> (i32, i32, i32, i32) {
    %c0_i32 = arith.constant 0 : i32
    %c0_i32_0 = arith.constant 0 : i32
    %c0_i32_1 = arith.constant 0 : i32
    %c0_i32_2 = arith.constant 0 : i32
    return %arg0, %c0_i32, %c0_i32_0, %c0_i32_1 : i32, i32, i32, i32
  }
  func.func @transform_1(%arg0: i32) -> (i32, i32) {
    %c0_i32 = arith.constant 0 : i32
    %c0_i32_0 = arith.constant 0 : i32
    %c0_i32_1 = arith.constant 0 : i32
    return %c0_i32, %c0_i32_0 : i32, i32
  }
  func.func @transform_2(%arg0: i32) -> (i32, i32) {
    %c0_i32 = arith.constant 0 : i32
    %c0_i32_0 = arith.constant 0 : i32
    %c0_i32_1 = arith.constant 0 : i32
    return %c0_i32, %c0_i32_0 : i32, i32
  }
  func.func @transform_3(%arg0: i32) -> (i32, i32) {
    %c0_i32 = arith.constant 0 : i32
    %c0_i32_0 = arith.constant 0 : i32
    %c0_i32_1 = arith.constant 0 : i32
    return %c0_i32, %c0_i32_0 : i32, i32
  }
  func.func @transform_4(%arg0: i32) -> (i32, i32) {
    %c0_i32 = arith.constant 0 : i32
    %c0_i32_0 = arith.constant 0 : i32
    %c0_i32_1 = arith.constant 0 : i32
    return %c0_i32, %c0_i32_0 : i32, i32
  }
  func.func @transform_5(%arg0: i32) -> (i32, i32) {
    %c0_i32 = arith.constant 0 : i32
    %c0_i32_0 = arith.constant 0 : i32
    return %arg0, %c0_i32 : i32, i32
  }
}

</mosaic_0001>

<bundles_post_ra>
// kernel: patch_merging_forward.1
= control target key start
LH: loop header
LB: loop body
LE: loop exit
PB: predicated region body
PF: predicated region fallthrough
CT: control target
= control target key end

     0   :  { %10 = vsyncpa [#allocation3], 0  ;;  %s2200_s0 = inlined_call_operand.vmem [shape: f32[32,2,8,64], index: 0, kind: input, shape index: {}]   ;;  %s2201_s1 = inlined_call_operand.vmem [shape: bf16[64,64], index: 1, kind: input, shape index: {}]   ;;  %s2202_s2 = inlined_call_operand.vmem [shape: bf16[64,64], index: 2, kind: input, shape index: {}]   ;;  %s2203_s3 = inlined_call_operand.vmem [shape: f32[1,64], index: 3, kind: input, shape index: {}]   ;;  %s2204_s4 = inlined_call_operand.vmem [shape: f32[1,64], index: 4, kind: input, shape index: {}]   ;;  %s2205_s5 = inlined_call_operand.hbm [shape: f32[256,64], index: 5, kind: output, shape index: {}]  }
   0x1   :  { %12 = vsyncpa [#allocation3 + $0x1], 0  ;;  %s1428_s18 = smov 0   ;;  %s1430_s19 = smov 0  }
   0x2   :  { %s1432_s20 = smov 0   ;;  %s1434_s21 = smov 0  }
   0x3 LB: > { %s1449_s22 = sadd.s32 4294967295, %s1393_s21   ;;  %s1139_s23 = sadd.s32 4294967294, %s1393_s21   ;;  %s1393_s21 = sphi %s1434_s21, %s2220_s21   ;;  %s1389_s20 = sphi %s1432_s20, %s2219_s20   ;;  %s1385_s19 = sphi %s1430_s19, %s2218_s19   ;;  %s1381_s18 = sphi %s1428_s18, %s2217_s18  }
   0x4   : > { %s1453_s24 = sadd.s32 1, %s1393_s21   ;;  %s135_s25 = sadd.s32 1, %s1389_s20 }
   0x5   : > { %s132_s26 = ssub.s32 %s1393_s21, %s1453_s24  ;;  %p145_p0 = scmp.ne.s32.totalorder %s1389_s20, %s1385_s19 }
   0x6   : > { %p133_p1 = scmp.eq.s32.totalorder %s132_s26, 0  ;;  %p146_p2 = scmp.eq.s32.totalorder %s1449_s22, 1 }
   0x7   : > { %p151_p3 = scmp.ne.s32.totalorder %s1385_s19, %s1381_s18  ;;  %p152_p4 = scmp.eq.s32.totalorder %s1139_s23, 1 }
   0x8   : > { %s1464_s27 = scalar_select %p133_p1, %s1389_s20, %s135_s25  }
   0x9   : > { %p1466_p5 = por %p146_p2, %p145_p0  ;;  %p1470_p6 = por %p152_p4, %p151_p3 }
   0xa   : > { %p1142_p7 = scmp.ge.s32.totalorder %s1393_s21, 1  ;;  %p192_p8 = scmp.lt.s32.totalorder %s1393_s21, 3 }
   0xc   : > { %p193_p9 = pnand %p1142_p7, %p192_p8 }
   0xe   : > { %196 = sbr.rel (%p193_p9) target bundleno = 341 (0x155), region = 40 }
  0x13   : > { %s1144_s30 = sshll.u32 %s1449_s22, 4  ;;  %v1293_v0 = vld [vmem:[%s2202_s2 + $0x18] sm:$0xff]   ;;  %v1295_v2 = vld [vmem:[%s2202_s2 + $0x10] sm:$0xff]   ;;  %vm262_vm0 = vcmask 523264   ;;  %v1297_v4 = vld [vmem:[%s2202_s2 + $0x8] sm:$0xff]   ;;  %s218_s10 = sand.u32 1, %s1385_s19  }
  0x14   : > { %p222_p10 = scmp.lt.s32.totalorder %s1144_s30, 31  ;;  %v1294_v1 = vld [vmem:[%s2201_s1 + $0x18] sm:$0xff]   ;;  %1204 = vmatprep.subr.bf16.mxu0 %v1293_v0  ;;  %v1296_v3 = vld [vmem:[%s2201_s1 + $0x10] sm:$0xff]   ;;  %v1298_v5 = vld [vmem:[%s2201_s1 + $0x8] sm:$0xff]   ;;  %s2030_s13 = sshll.u32 %s218_s10, 7 }
  0x15   : > { %1228 = vmatprep.subr.bf16.mxu1 %v1294_v1  ;;  %1205 = vmatpush3.bf16.msra.mxu0 %v1293_v0  ;;  %v1299_v23 = vld [vmem:[%s2202_s2] sm:$0xff]   ;;  %s2054_s16 = scalar_lea.vmem [#allocation2], %s2030_s13  ;;  %s1179_s17 = sshll.u32 %s1449_s22, 11 }
  0x16   : > { %s2222_s30 = smov (!%p222_p10, %s1144_s30), 31  ;;  %1229 = vmatpush3.bf16.msra.mxu1 %v1294_v1  ;;  %1206 = vmatprep.subr.bf16.mxu0 %v1295_v2  ;;  %v1300_v24 = vld [vmem:[%s2201_s1] sm:$0xff]   ;;  %s1077_s23 = sshll.u32 %s2054_s16, 4  ;;  %s2151_s23 = int_to_ptr.vmem [resolvable:$true] %s1077_s23 }
  0x17   : > { %s1178_s14 = sshll.u32 %s2222_s30, 4  ;;  %1230 = vmatprep.subr.bf16.mxu1 %v1296_v3  ;;  %s2149_s6 = scalar_lea.hbm %s2205_s5, %s1179_s17 }
  0x18   : > { %s1495_s25 = scalar_lea.vmem %s2200_s0, %s1178_s14  ;;  %s2160_s22 = scalar_lea.sflag [#allocation3], %s218_s10 }
  0x19   : > { %v1501_v6 = vld [vmem:[%s1495_s25 + $0x20] sm:$0xff]  ;;  %v1507_v8 = vld [vmem:[%s1495_s25 + $0x30] sm:$0xff]  ;;  %1207 = vmatpush3.bf16.msra.mxu0 %v1295_v2  ;;  %v1537_v20 = vld [vmem:[%s1495_s25 + $0x18] sm:$0xff]  ;;  %s1333_s30 = scalar_lea.vmem %s2151_s23, 2048  ;;  %s1395_s7 = smov [#allocation2]  }
  0x1a   : > { %v1504_v7 = vld [vmem:[%s1495_s25] sm:$0xff]  ;;  %v269_v9 = vsel %vm262_vm0, %v1501_v6, 0.0  ;;  %v1514_v11 = vld [vmem:[%s1495_s25 + $0x10] sm:$0xff]  ;;  %v272_v12 = vsel %vm262_vm0, %v1507_v8, 0.0  ;;  %1231 = vmatpush3.bf16.msra.mxu1 %v1296_v3  ;;  %1208 = vmatprep.subr.bf16.mxu0 %v1297_v4  ;;  %v1540_v21 = vld [vmem:[%s1495_s25 + $0x8] sm:$0xff]  ;;  %v632_v25 = vpack.c.bf16 %v1507_v8, %v1501_v6  ;;  %p1334_p11 = scmp.ne.s32.totalorder %s2151_s23, %s1333_s30  ;;  %s1337_s8 = sshll.u32 %s1395_s7, 4  ;;  %s1338_s8 = int_to_ptr.vmem [resolvable:$false] %s1337_s8 }
  0x1b   : > { %v263_v10 = vsel %vm262_vm0, %v1504_v7, 0.0  ;;  %270 = vadd.xlane.f32.xlu1 %v269_v9  ;;  %v266_v13 = vsel %vm262_vm0, %v1514_v11, 0.0  ;;  %v1521_v14 = vld [vmem:[%s1495_s25 + $0x50] sm:$0xff]  ;;  %v1524_v15 = vld [vmem:[%s1495_s25 + $0x40] sm:$0xff]  ;;  %1232 = vmatprep.subr.bf16.mxu1 %v1298_v5  ;;  %v1543_v22 = vld [vmem:[%s1495_s25 + $0x38] sm:$0xff]  ;;  %v647_v32 = vpack.c.bf16 %v1537_v20, %v1540_v21  ;;  %v631_v33 = vpack.c.bf16 %v1514_v11, %v1504_v7  ;;  %s1339_s9 = scalar_lea.vmem %s1338_s8, 4096  ;;  %p1340_p0 = scmp.lt.s32.totalorder %s2151_s23, %s1338_s8 }
  0x1c   : > { %264 = vadd.xlane.f32.xlu0 %v263_v10  ;;  %v278_v16 = vsel %vm262_vm0, %v1521_v14, 0.0  ;;  %v275_v17 = vsel %vm262_vm0, %v1524_v15, 0.0  ;;  %v1531_v18 = vld [vmem:[%s1495_s25 + $0x70] sm:$0xff]  ;;  %v1534_v19 = vld [vmem:[%s1495_s25 + $0x60] sm:$0xff]  ;;  %v1556_v27 = vld [vmem:[%s1495_s25 + $0x28] sm:$0xff]  ;;  %v633_v34 = vpack.c.bf16 %v1521_v14, %v1524_v15  ;;  %p1335_p12 = pnand %p1334_p11, %p1466_p5  ;;  %p1341_p1 = scmp.lt.s32.totalorder %s1339_s9, %s1333_s30 }
  0x1d   : > { %1209 = vmatpush3.bf16.msra.mxu0 %v1297_v4  ;;  %v284_v26 = vsel %vm262_vm0, %v1531_v18, 0.0  ;;  %v281_v28 = vsel %vm262_vm0, %v1534_v19, 0.0  ;;  %v648_v29 = vpack.c.bf16 %v1543_v22, %v1556_v27  ;;  %v1563_v30 = vld [vmem:[%s1495_s25 + $0x58] sm:$0xff]  ;;  %v1566_v31 = vld [vmem:[%s1495_s25 + $0x48] sm:$0xff]  ;;  %v1575_v35 = vld [vmem:[%s1495_s25 + $0x90] sm:$0xff]  ;;  %1212 = vmatprep.mubr.msk.bf16.mxu0 %vm262_vm0, %v647_v32  ;;  %v634_v44 = vpack.c.bf16 %v1531_v18, %v1534_v19 }
  0x1e   : > { %1233 = vmatpush3.bf16.msra.mxu1 %v1298_v5  ;;  %1210 = vmatprep.subr.bf16.mxu0 %v1299_v23  ;;  %v1578_v36 = vld [vmem:[%s1495_s25 + $0x80] sm:$0xff]  ;;  %v649_v37 = vpack.c.bf16 %v1563_v30, %v1566_v31  ;;  %v290_v38 = vsel %vm262_vm0, %v1575_v35, 0.0  ;;  %v1591_v40 = vld [vmem:[%s1495_s25 + $0xb0] sm:$0xff]  ;;  %v1599_v42 = vld [vmem:[%s1495_s25 + $0x78] sm:$0xff]  ;;  %v378_v4 = vsel %vm262_vm0, %v1537_v20, 0.0  ;;  %v375_v5 = vsel %vm262_vm0, %v1540_v21, 0.0  ;;  %p1336_p13 = pneg %p1335_p12  ;;  %p1342_p2 = por %p1341_p1, %p1340_p0 }
  0x1f   : > { %273 = vadd.xlane.f32.xlu1 %v272_v12  ;;  %1234 = vmatprep.subr.bf16.mxu1 %v1300_v24  ;;  %v287_v39 = vsel %vm262_vm0, %v1578_v36, 0.0  ;;  %v1594_v41 = vld [vmem:[%s1495_s25 + $0xa0] sm:$0xff]  ;;  %v1602_v43 = vld [vmem:[%s1495_s25 + $0x68] sm:$0xff]  ;;  %v296_v45 = vsel %vm262_vm0, %v1591_v40, 0.0  ;;  %v1613_v48 = vld [vmem:[%s1495_s25 + $0x98] sm:$0xff]  ;;  %v635_v50 = vpack.c.bf16 %v1575_v35, %v1578_v36 }
  0x20   : > { %267 = vadd.xlane.f32.xlu0 %v266_v13  ;;  %1236 = vmatprep.mubr.msk.bf16.mxu1 %vm262_vm0, %v631_v33  ;;  %v293_v46 = vsel %vm262_vm0, %v1594_v41, 0.0  ;;  %v650_v47 = vpack.c.bf16 %v1599_v42, %v1602_v43  ;;  %v1616_v49 = vld [vmem:[%s1495_s25 + $0x88] sm:$0xff]  ;;  %v1621_v51 = vld [vmem:[%s1495_s25 + $0xd0] sm:$0xff]  ;;  %v1624_v52 = vld [vmem:[%s1495_s25 + $0xc0] sm:$0xff]  ;;  %v636_v60 = vpack.c.bf16 %v1591_v40, %v1594_v41  ;;  %v384_v13 = vsel %vm262_vm0, %v1543_v22, 0.0  ;;  %p1343_p3 = pnand %p1342_p2, %p1336_p13 }
  0x21   : > { %1211 = vmatpush3.bf16.msra.mxu0 %v1299_v23  ;;  %v651_v53 = vpack.c.bf16 %v1613_v48, %v1616_v49  ;;  %v302_v54 = vsel %vm262_vm0, %v1621_v51, 0.0  ;;  %v299_v55 = vsel %vm262_vm0, %v1624_v52, 0.0  ;;  %v1635_v56 = vld [vmem:[%s1495_s25 + $0xf0] sm:$0xff]  ;;  %v1638_v57 = vld [vmem:[%s1495_s25 + $0xe0] sm:$0xff]  ;;  %v1643_v58 = vld [vmem:[%s1495_s25 + $0xb8] sm:$0xff]  ;;  %v637_v2 = vpack.c.bf16 %v1621_v51, %v1624_v52 }
  0x22   : > { %1235 = vmatpush3.bf16.msra.mxu1 %v1300_v24  ;;  %v1646_v59 = vld [vmem:[%s1495_s25 + $0xa8] sm:$0xff]  ;;  %v308_v61 = vsel %vm262_vm0, %v1635_v56, 0.0  ;;  %v305_v62 = vsel %vm262_vm0, %v1638_v57, 0.0  ;;  %v1657_v0 = vld [vmem:[%s1495_s25 + $0xd8] sm:$0xff]  ;;  %v638_v12 = vpack.c.bf16 %v1635_v56, %v1638_v57  ;;  %v390_v23 = vsel %vm262_vm0, %v1563_v30, 0.0 }
  0x23   : > { %279 = vadd.xlane.f32.xlu1 %v278_v16  ;;  %v652_v63 = vpack.c.bf16 %v1643_v58, %v1646_v59  ;;  %v1660_v1 = vld [vmem:[%s1495_s25 + $0xc8] sm:$0xff]  ;;  %v1675_v9 = vld [vmem:[%s1495_s25 + $0xf8] sm:$0xff]  ;;  %v381_v16 = vsel %vm262_vm0, %v1556_v27, 0.0  ;;  %v387_v24 = vsel %vm262_vm0, %v1566_v31, 0.0  ;;  %v408_v32 = vsel %vm262_vm0, %v1643_v58, 0.0 }
  0x24   : > { %276 = vadd.xlane.f32.xlu0 %v275_v17  ;;  %1213 = vmatmul.mubr.msk.bf16.vlgmr.msra.gmra.mxu0 %vm262_vm0, %v648_v29  ;;  %v653_v3 = vpack.c.bf16 %v1657_v0, %v1660_v1  ;;  %v1678_v10 = vld [vmem:[%s1495_s25 + $0xe8] sm:$0xff]  ;;  %v399_v29 = vsel %vm262_vm0, %v1616_v49, 0.0  ;;  %v405_v33 = vsel %vm262_vm0, %v1646_v59, 0.0 }
  0x25   : > { %1237 = vmatmul.mubr.msk.bf16.vlgmr.msra.gmra.mxu1 %vm262_vm0, %v632_v25  ;;  %1216 = vmatprep.mubr.msk.bf16.mxu0 %vm262_vm0, %v649_v37  ;;  %v654_v17 = vpack.c.bf16 %v1675_v9, %v1678_v10  ;;  %v396_v25 = vsel %vm262_vm0, %v1599_v42, 0.0  ;;  %v411_v37 = vsel %vm262_vm0, %v1660_v1, 0.0 }
  0x26   : > { %1240 = vmatprep.mubr.msk.bf16.mxu1 %vm262_vm0, %v633_v34  ;;  %v414_v34 = vsel %vm262_vm0, %v1657_v0, 0.0 }
  0x27   : > { %285 = vadd.xlane.f32.xlu1 %v284_v26  ;;  %v393_v26 = vsel %vm262_vm0, %v1602_v43, 0.0 }
  0x28   : > { %282 = vadd.xlane.f32.xlu0 %v281_v28  ;;  %v402_v28 = vsel %vm262_vm0, %v1613_v48, 0.0 }
  0x2b   : > { %291 = vadd.xlane.f32.xlu1 %v290_v38  ;;  %v420_v38 = vsel %vm262_vm0, %v1675_v9, 0.0 }
  0x2c   : > { %288 = vadd.xlane.f32.xlu0 %v287_v39  ;;  %1217 = vmatmul.mubr.msk.bf16.gmra.mxu0 %vm262_vm0, %v650_v47  ;;  %v417_v39 = vsel %vm262_vm0, %v1678_v10, 0.0 }
  0x2d   : > { %1241 = vmatmul.mubr.msk.bf16.gmra.mxu1 %vm262_vm0, %v634_v44  ;;  %1220 = vmatprep.mubr.msk.bf16.mxu0 %vm262_vm0, %v651_v53  ;;  %v312_v44 = vmul.f32 %v1514_v11, %v1514_v11  ;;  %v313_v53 = vmul.f32 %v1501_v6, %v1501_v6  ;;  %v318_v6 = vmul.f32 %v1531_v18, %v1531_v18 }
  0x2e   : > { %1244 = vmatprep.mubr.msk.bf16.mxu1 %vm262_vm0, %v635_v50  ;;  %v314_v50 = vmul.f32 %v1507_v8, %v1507_v8 }
  0x2f   : > { %297 = vadd.xlane.f32.xlu1 %v296_v45  ;;  %v311_v45 = vmul.f32 %v1504_v7, %v1504_v7  ;;  %v333_v11 = vsel %vm262_vm0, %v313_v53, 0.0  ;;  %v316_v7 = vmul.f32 %v1521_v14, %v1521_v14 }
  0x30   : > { %294 = vadd.xlane.f32.xlu0 %v293_v46  ;;  %v330_v46 = vsel %vm262_vm0, %v312_v44, 0.0 }
  0x31   : > { %v327_v47 = vsel %vm262_vm0, %v311_v45, 0.0  ;;  %v437_v45 = vmul.f32 %v1678_v10, %v1678_v10 }
  0x33   : > { %303 = vadd.xlane.f32.xlu1 %v302_v54  ;;  %v336_v54 = vsel %vm262_vm0, %v314_v50, 0.0 }
  0x34   : > { %300 = vadd.xlane.f32.xlu0 %v299_v55  ;;  %1221 = vmatmul.mubr.msk.bf16.gmra.mxu0 %vm262_vm0, %v652_v63  ;;  %v315_v55 = vmul.f32 %v1524_v15, %v1524_v15  ;;  %v320_v15 = vmul.f32 %v1575_v35, %v1575_v35  ;;  %v319_v63 = vmul.f32 %v1578_v36, %v1578_v36 }
  0x35   : > { %1245 = vmatmul.mubr.msk.bf16.gmra.mxu1 %vm262_vm0, %v636_v60  ;;  %1224 = vmatprep.mubr.msk.bf16.mxu0 %vm262_vm0, %v653_v3  ;;  %v342_v60 = vsel %vm262_vm0, %v316_v7, 0.0  ;;  %v321_v3 = vmul.f32 %v1594_v41, %v1594_v41  ;;  %v324_v36 = vmul.f32 %v1621_v51, %v1621_v51  ;;  %v326_v41 = vmul.f32 %v1635_v56, %v1635_v56 }
  0x36   : > { %1248 = vmatprep.mubr.msk.bf16.mxu1 %vm262_vm0, %v637_v2  ;;  %v339_v8 = vsel %vm262_vm0, %v315_v55, 0.0  ;;  %v354_v2 = vsel %vm262_vm0, %v320_v15, 0.0  ;;  %v351_v18 = vsel %vm262_vm0, %v319_v63, 0.0 }
  0x37   : > { %309 = vadd.xlane.f32.xlu1 %v308_v61  ;;  %v317_v61 = vmul.f32 %v1534_v19, %v1534_v19  ;;  %v322_v19 = vmul.f32 %v1591_v40, %v1591_v40  ;;  %v357_v35 = vsel %vm262_vm0, %v321_v3, 0.0 }
  0x38   : > { %306 = vadd.xlane.f32.xlu0 %v305_v62  ;;  %v348_v62 = vsel %vm262_vm0, %v318_v6, 0.0 }
  0x39   : > { %v345_v14 = vsel %vm262_vm0, %v317_v61, 0.0 }
  0x3b   : > { %379 = vadd.xlane.f32.xlu1 %v378_v4  ;;  %v360_v4 = vsel %vm262_vm0, %v322_v19, 0.0 }
  0x3c   : > { %376 = vadd.xlane.f32.xlu0 %v375_v5  ;;  %1225 = vmatmul.mubr.msk.bf16.gmra.mxu0 %vm262_vm0, %v654_v17  ;;  %v323_v5 = vmul.f32 %v1624_v52, %v1624_v52  ;;  %v424_v52 = vmul.f32 %v1537_v20, %v1537_v20  ;;  %v423_v17 = vmul.f32 %v1540_v21, %v1540_v21 }
  0x3d   : > { %1249 = vmatmul.mubr.msk.bf16.gmra.mxu1 %vm262_vm0, %v638_v12  ;;  %v366_v12 = vsel %vm262_vm0, %v324_v36, 0.0  ;;  %v428_v21 = vmul.f32 %v1563_v30, %v1563_v30 }
  0x3e   : > { %v363_v40 = vsel %vm262_vm0, %v323_v5, 0.0  ;;  %v439_v56 = vsel %vm262_vm0, %v423_v17, 0.0 }
  0x3f   : > { %385 = vadd.xlane.f32.xlu1 %v384_v13  ;;  %v325_v13 = vmul.f32 %v1638_v57, %v1638_v57  ;;  %v426_v57 = vmul.f32 %v1543_v22, %v1543_v22 }
  0x40   : > { %382 = vadd.xlane.f32.xlu0 %v381_v16  ;;  %v372_v16 = vsel %vm262_vm0, %v326_v41, 0.0 }
  0x41   : > { %v369_v51 = vsel %vm262_vm0, %v325_v13, 0.0 }
  0x43   : > { %391 = vadd.xlane.f32.xlu1 %v390_v23  ;;  %v442_v23 = vsel %vm262_vm0, %v424_v52, 0.0 }
  0x44   : > { %388 = vadd.xlane.f32.xlu0 %v387_v24  ;;  %v425_v24 = vmul.f32 %v1556_v27, %v1556_v27  ;;  %v430_v27 = vmul.f32 %v1599_v42, %v1599_v42 }
  0x46   : > { %v445_v20 = vsel %vm262_vm0, %v425_v24, 0.0 }
  0x47   : > { %397 = vadd.xlane.f32.xlu1 %v396_v25  ;;  %v448_v25 = vsel %vm262_vm0, %v426_v57, 0.0 }
  0x48   : > { %394 = vadd.xlane.f32.xlu0 %v393_v26  ;;  %v427_v26 = vmul.f32 %v1566_v31, %v1566_v31  ;;  %v432_v31 = vmul.f32 %v1613_v48, %v1613_v48 }
  0x4a   : > { %v451_v22 = vsel %vm262_vm0, %v427_v26, 0.0 }
  0x4b   : > { %403 = vadd.xlane.f32.xlu1 %v402_v28  ;;  %v454_v28 = vsel %vm262_vm0, %v428_v21, 0.0 }
  0x4c   : > { %400 = vadd.xlane.f32.xlu0 %v399_v29  ;;  %v429_v29 = vmul.f32 %v1602_v43, %v1602_v43  ;;  %v434_v43 = vmul.f32 %v1643_v58, %v1643_v58 }
  0x4e   : > { %v457_v30 = vsel %vm262_vm0, %v429_v29, 0.0 }
  0x4f   : > { %409 = vadd.xlane.f32.xlu1 %v408_v32  ;;  %v460_v32 = vsel %vm262_vm0, %v430_v27, 0.0 }
  0x50   : > { %406 = vadd.xlane.f32.xlu0 %v405_v33  ;;  %v431_v33 = vmul.f32 %v1616_v49, %v1616_v49  ;;  %v436_v49 = vmul.f32 %v1657_v0, %v1657_v0  ;;  %v481_v0 = vsel %vm262_vm0, %v437_v45, 0.0 }
  0x52   : > { %v463_v42 = vsel %vm262_vm0, %v431_v33, 0.0  ;;  %v478_v44 = vsel %vm262_vm0, %v436_v49, 0.0 }
  0x53   : > { %415 = vadd.xlane.f32.xlu1 %v414_v34  ;;  %v466_v34 = vsel %vm262_vm0, %v432_v31, 0.0 }
  0x54   : > { %412 = vadd.xlane.f32.xlu0 %v411_v37  ;;  %v433_v37 = vmul.f32 %v1646_v59, %v1646_v59  ;;  %v438_v59 = vmul.f32 %v1675_v9, %v1675_v9 }
  0x56   : > { %v469_v48 = vsel %vm262_vm0, %v433_v37, 0.0 }
  0x57   : > { %421 = vadd.xlane.f32.xlu1 %v420_v38  ;;  %v472_v38 = vsel %vm262_vm0, %v434_v43, 0.0 }
  0x58   : > { %418 = vadd.xlane.f32.xlu0 %v417_v39  ;;  %v435_v39 = vmul.f32 %v1660_v1, %v1660_v1 }
  0x5a   : > { %v475_v58 = vsel %vm262_vm0, %v435_v39, 0.0 }
  0x5b   : > { %331 = vadd.xlane.f32.xlu1 %v330_v46  ;;  %v484_v46 = vsel %vm262_vm0, %v438_v59, 0.0 }
  0x5c   : > { %328 = vadd.xlane.f32.xlu0 %v327_v47 }
  0x5f   : > { %337 = vadd.xlane.f32.xlu1 %v336_v54 }
  0x60   : > { %334 = vadd.xlane.f32.xlu0 %v333_v11 }
  0x63   : > { %343 = vadd.xlane.f32.xlu1 %v342_v60 }
  0x64   : > { %340 = vadd.xlane.f32.xlu0 %v339_v8 }
  0x67   : > { %349 = vadd.xlane.f32.xlu1 %v348_v62 }
  0x68   : > { %346 = vadd.xlane.f32.xlu0 %v345_v14 }
  0x6b   : > { %355 = vadd.xlane.f32.xlu1 %v354_v2 }
  0x6c   : > { %352 = vadd.xlane.f32.xlu0 %v351_v18 }
  0x6f   : > { %361 = vadd.xlane.f32.xlu1 %v360_v4 }
  0x70   : > { %358 = vadd.xlane.f32.xlu0 %v357_v35 }
  0x73   : > { %367 = vadd.xlane.f32.xlu1 %v366_v12 }
  0x74   : > { %364 = vadd.xlane.f32.xlu0 %v363_v40 }
  0x77   : > { %373 = vadd.xlane.f32.xlu1 %v372_v16 }
  0x78   : > { %370 = vadd.xlane.f32.xlu0 %v369_v51 }
  0x7b   : > { %443 = vadd.xlane.f32.xlu1 %v442_v23 }
  0x7c   : > { %440 = vadd.xlane.f32.xlu0 %v439_v56 }
  0x7f   : > { %449 = vadd.xlane.f32.xlu1 %v448_v25 }
  0x80   : > { %446 = vadd.xlane.f32.xlu0 %v445_v20 }
  0x83   : > { %455 = vadd.xlane.f32.xlu1 %v454_v28 }
  0x84   : > { %452 = vadd.xlane.f32.xlu0 %v451_v22 }
  0x87   : > { %461 = vadd.xlane.f32.xlu1 %v460_v32 }
  0x88   : > { %458 = vadd.xlane.f32.xlu0 %v457_v30 }
  0x8b   : > { %467 = vadd.xlane.f32.xlu1 %v466_v34 }
  0x8c   : > { %464 = vadd.xlane.f32.xlu0 %v463_v42 }
  0x8f   : > { %473 = vadd.xlane.f32.xlu1 %v472_v38 }
  0x90   : > { %470 = vadd.xlane.f32.xlu0 %v469_v48 }
  0x93   : > { %479 = vadd.xlane.f32.xlu1 %v478_v44 }
  0x94   : > { %476 = vadd.xlane.f32.xlu0 %v475_v58 }
  0x97   : > { %485 = vadd.xlane.f32.xlu1 %v484_v46 }
  0x98   : > { %482 = vadd.xlane.f32.xlu0 %v481_v0 }
  0xa4   : > { %v271_v1 = vpop.xlane.xlu1 %270 }
  0xa5   : > { %v265_v47 = vpop.xlane.xlu0 %264 }
  0xa8   : > { %v274_v50 = vpop.xlane.xlu1 %273 }
  0xa9   : > { %v268_v53 = vpop.xlane.xlu0 %267 }
  0xac   : > { %v280_v54 = vpop.xlane.xlu1 %279 }
  0xad   : > { %v277_v11 = vpop.xlane.xlu0 %276 }
  0xb0   : > { %v286_v7 = vpop.xlane.xlu1 %285 }
  0xb1   : > { %v283_v55 = vpop.xlane.xlu0 %282 }
  0xb4   : > { %v292_v9 = vpop.xlane.xlu1 %291 }
  0xb5   : > { %v1810_v60 = vpop.xlane.xlu0 %288 }
  0xb8   : > { %v1812_v10 = vpop.xlane.xlu1 %297 }
  0xb9   : > { %v1814_v8 = vpop.xlane.xlu0 %294 }
  0xbc   : > { %v304_v6 = vpop.xlane.xlu1 %303 }
  0xbd   : > { %v301_v61 = vpop.xlane.xlu0 %300 }
  0xc0   : > { %v310_v62 = vpop.xlane.xlu1 %309 }
  0xc1   : > { %v307_v14 = vpop.xlane.xlu0 %306 }
  0xc4   : > { %v380_v15 = vpop.xlane.xlu1 %379 }
  0xc5   : > { %v377_v63 = vpop.xlane.xlu0 %376  ;;  %v488_v49 = vadd.f32 %v380_v15, %v268_v53 }
  0xc6   : > { %v487_v39 = vadd.f32 %v377_v63, %v265_v47 }
  0xc8   : > { %v386_v2 = vpop.xlane.xlu1 %385 }
  0xc9   : > { %v383_v18 = vpop.xlane.xlu0 %382  ;;  %v490_v59 = vadd.f32 %v386_v2, %v274_v50 }
  0xca   : > { %v489_v45 = vadd.f32 %v383_v18, %v271_v1 }
  0xcc   : > { %v392_v19 = vpop.xlane.xlu1 %391  ;;  %v1872_v15 = vmul.f32 0.0078125, %v489_v45 }
  0xcd   : > { %v389_v3 = vpop.xlane.xlu0 %388  ;;  %v492_v4 = vadd.f32 %v392_v19, %v280_v54  ;;  %v1862_v54 = vmul.f32 0.0078125, %v488_v49 }
  0xcf   : > { %v552_v19 = vmul.f32 %v1862_v54, %v1862_v54 }
  0xd0   : > { %v398_v35 = vpop.xlane.xlu1 %397 }
  0xd1   : > { %v395_v36 = vpop.xlane.xlu0 %394 }
  0xd2   : > { %v493_v53 = vadd.f32 %v395_v36, %v283_v55 }
  0xd4   : > { %v404_v5 = vpop.xlane.xlu1 %403 }
  0xd5   : > { %v401_v12 = vpop.xlane.xlu0 %400  ;;  %v1816_v40 = vadd.f32 %v404_v5, %v292_v9  ;;  %v1864_v9 = vmul.f32 0.0078125, %v487_v39 }
  0xd6   : > { %v495_v1 = vadd.f32 %v401_v12, %v1810_v60  ;;  %v553_v12 = vmul.f32 %v1872_v15, %v1872_v15 }
  0xd8   : > { %v410_v41 = vpop.xlane.xlu1 %409 }
  0xd9   : > { %v407_v13 = vpop.xlane.xlu0 %406  ;;  %v498_v50 = vadd.f32 %v410_v41, %v1812_v10  ;;  %v1889_v10 = vmul.f32 0.0078125, %v493_v53 }
  0xda   : > { %v497_v63 = vadd.f32 %v407_v13, %v1814_v8 }
  0xdb   : > { %v1918_v53 = vmul.f32 %v1889_v10, %v1889_v10 }
  0xdc   : > { %v416_v16 = vpop.xlane.xlu1 %415 }
  0xdd   : > { %v413_v51 = vpop.xlane.xlu0 %412  ;;  %v1818_v52 = vadd.f32 %v416_v16, %v304_v6  ;;  %v1898_v16 = vmul.f32 0.0078125, %v1816_v40 }
  0xde   : > { %v1820_v17 = vadd.f32 %v413_v51, %v301_v61  ;;  %v491_v61 = vadd.f32 %v389_v3, %v277_v11  ;;  %v551_v11 = vmul.f32 %v1864_v9, %v1864_v9  ;;  %v1902_v51 = vmul.f32 0.0078125, %v498_v50 }
  0xdf   : > { %2211 = vst [vmem:[#allocation5_spill] sm:$0xff] %v1898_v16 }
  0xe0   : > { %v422_v23 = vpop.xlane.xlu1 %421  ;;  %v1885_v36 = vmul.f32 0.0078125, %v491_v61  ;;  %2212 = vst [vmem:[#allocation6_spill] sm:$0xff] %v1902_v51 }
  0xe1   : > { %v419_v56 = vpop.xlane.xlu0 %418  ;;  %v1822_v57 = vadd.f32 %v422_v23, %v310_v62  ;;  %v494_v62 = vadd.f32 %v398_v35, %v286_v7  ;;  %v1883_v35 = vmul.f32 0.0078125, %v492_v4  ;;  %v1900_v4 = vmul.f32 0.0078125, %v495_v1 }
  0xe2   : > { %v1824_v24 = vadd.f32 %v419_v56, %v307_v14  ;;  %v1870_v14 = vmul.f32 0.0078125, %v490_v59  ;;  %v1904_v23 = vmul.f32 0.0078125, %v497_v63  ;;  %v555_v40 = vmul.f32 %v1885_v36, %v1885_v36 }
  0xe3   : > { %v1887_v60 = vmul.f32 0.0078125, %v494_v62  ;;  %v556_v61 = vmul.f32 %v1883_v35, %v1883_v35 }
  0xe4   : > { %v332_v25 = vpop.xlane.xlu1 %331  ;;  %v1838_v31 = vpop.f32.mrf.mxu0  ;;  %v554_v5 = vmul.f32 %v1870_v14, %v1870_v14  ;;  %2213 = vst [vmem:[#allocation7_spill] sm:$0xff] %v1904_v23 }
  0xe5   : > { %v329_v20 = vpop.xlane.xlu0 %328  ;;  %v1840_v33 = vpop.f32.mrf.mxu1  ;;  %v1914_v62 = vmul.f32 %v1887_v60, %v1887_v60 }
  0xe6   : > { %v1846_v43 = vpop.f32.mrf.mxu0 }
  0xe7   : > { %v1848_v37 = vpop.f32.mrf.mxu1 }
  0xe8   : > { %v338_v21 = vpop.xlane.xlu1 %337  ;;  %v1854_v44 = vpop.f32.mrf.mxu0 }
  0xe9   : > { %v335_v26 = vpop.xlane.xlu0 %334  ;;  %v1856_v58 = vpop.f32.mrf.mxu1 }
  0xea   : > { %v1866_v6 = vpop.f32.mrf.mxu0 }
  0xeb   : > { %v1868_v47 = vpop.f32.mrf.mxu1 }
  0xec   : > { %v1826_v28 = vpop.xlane.xlu1 %343  ;;  %v1881_v3 = vpop.f32.mrf.mxu0 }
  0xed   : > { %v1828_v22 = vpop.xlane.xlu0 %340  ;;  %v1891_v8 = vpop.f32.mrf.mxu1 }
  0xee   : > { %v1906_v45 = vpop.f32.mrf.mxu0 }
  0xef   : > { %v1920_v1 = vpop.f32.mrf.mxu1 }
  0xf0   : > { %v1830_v27 = vpop.xlane.xlu1 %349 }
  0xf1   : > { %v1832_v29 = vpop.xlane.xlu0 %346 }
  0xf4   : > { %v1834_v32 = vpop.xlane.xlu1 %355 }
  0xf5   : > { %v1836_v30 = vpop.xlane.xlu0 %352 }
  0xf8   : > { %v1842_v34 = vpop.xlane.xlu1 %361 }
  0xf9   : > { %v1844_v42 = vpop.xlane.xlu0 %358 }
  0xfc   : > { %v1850_v38 = vpop.xlane.xlu1 %367 }
  0xfd   : > { %v1852_v48 = vpop.xlane.xlu0 %364 }
 0x100   : > { %v1858_v46 = vpop.xlane.xlu1 %373 }
 0x101   : > { %v1860_v0 = vpop.xlane.xlu0 %370 }
 0x104   : > { %v444_v2 = vpop.xlane.xlu1 %443 }
 0x105   : > { %v441_v18 = vpop.xlane.xlu0 %440  ;;  %v520_v7 = vadd.f32 %v444_v2, %v332_v25  ;;  %v1924_v2 = vmul.f32 %v1898_v16, %v1898_v16  ;;  %v1951_v16 = vmul.f32 0.0078125, %v1822_v57 }
 0x106   : > { %v519_v55 = vadd.f32 %v441_v18, %v329_v20  ;;  %v1928_v18 = vmul.f32 %v1900_v4, %v1900_v4 }
 0x107   : > { %v536_v41 = vmul.f32 0.0078125, %v520_v7 }
 0x108   : > { %v535_v13 = vmul.f32 0.0078125, %v519_v55  ;;  %v450_v56 = vpop.xlane.xlu1 %449 }
 0x109   : > { %v447_v25 = vpop.xlane.xlu0 %446  ;;  %v568_v20 = vsub.f32 %v536_v41, %v552_v19  ;;  %v522_v39 = vadd.f32 %v450_v56, %v338_v21  ;;  %v1932_v19 = vmul.f32 %v1902_v51, %v1902_v51 }
 0x10a   : > { %v567_v49 = vsub.f32 %v535_v13, %v551_v11  ;;  %v521_v59 = vadd.f32 %v447_v25, %v335_v26  ;;  %v1936_v11 = vmul.f32 %v1904_v23, %v1904_v23  ;;  %v1948_v23 = vpop.f32.mrf.mxu1 }
 0x10b   : > { %v584_v21 = vmax.f32 %v568_v20, 0.0  ;;  %v538_v50 = vmul.f32 0.0078125, %v522_v39  ;;  %v1938_v20 = vpop.f32.mrf.mxu0  ;;  %v1944_v39 = vmul.f32 0.0078125, %v1820_v17 }
 0x10c   : > { %v583_v26 = vmax.f32 %v567_v49, 0.0  ;;  %v537_v63 = vmul.f32 0.0078125, %v521_v59  ;;  %v456_v7 = vpop.xlane.xlu1 %455  ;;  %v1941_v49 = vmul.f32 0.0078125, %v1818_v52 }
 0x10d   : > { %v453_v55 = vpop.xlane.xlu0 %452  ;;  %v600_v41 = vadd.f32 1e-05, %v584_v21  ;;  %v570_v56 = vsub.f32 %v538_v50, %v554_v5  ;;  %v524_v59 = vadd.f32 %v456_v7, %v1826_v28  ;;  %v1954_v21 = vmul.f32 0.0078125, %v1824_v24 }
 0x10e   : > { %v599_v13 = vadd.f32 1e-05, %v583_v26  ;;  %v569_v25 = vsub.f32 %v537_v63, %v553_v12  ;;  %v523_v51 = vadd.f32 %v453_v55, %v1828_v22  ;;  %v764_v55 = vpop.f32.mrf.mxu0  ;;  %v1960_v57 = vmul.f32 %v1941_v49, %v1941_v49 }
 0x10f   : > { %1301 = vrsqrt.f32 %v600_v41  ;;  %v586_v5 = vmax.f32 %v570_v56, 0.0  ;;  %v540_v52 = vmul.f32 0.0078125, %v524_v59  ;;  %v1964_v24 = vmul.f32 %v1944_v39, %v1944_v39 }
 0x110   : > { %v585_v12 = vmax.f32 %v569_v25, 0.0  ;;  %1303 = vrsqrt.f32 %v599_v13  ;;  %v539_v26 = vmul.f32 0.0078125, %v523_v51  ;;  %v462_v17 = vpop.xlane.xlu1 %461  ;;  %v909_v51 = vpop.f32.mrf.mxu1  ;;  %v1968_v56 = vmul.f32 %v1951_v16, %v1951_v16 }
 0x111   : > { %v459_v50 = vpop.xlane.xlu0 %458  ;;  %v602_v63 = vadd.f32 1e-05, %v586_v5  ;;  %v526_v22 = vadd.f32 %v462_v17, %v1830_v27  ;;  %v572_v41 = vsub.f32 %v540_v52, %v556_v61 }
 0x112   : > { %v601_v28 = vadd.f32 1e-05, %v585_v12  ;;  %v525_v7 = vadd.f32 %v459_v50, %v1832_v29  ;;  %v571_v13 = vsub.f32 %v539_v26, %v555_v40  ;;  %v1972_v29 = vmul.f32 %v1954_v21, %v1954_v21  ;;  %v1978_v50 = vpop.f32.mrf.mxu0 }
 0x113   : > { %1305 = vrsqrt.f32 %v602_v63  ;;  %v542_v27 = vmul.f32 0.0078125, %v526_v22  ;;  %v588_v59 = vmax.f32 %v572_v41, 0.0  ;;  %v1986_v41 = vpop.f32.mrf.mxu1 }
 0x114   : > { %v541_v25 = vmul.f32 0.0078125, %v525_v7  ;;  %1307 = vrsqrt.f32 %v601_v28  ;;  %v587_v5 = vmax.f32 %v571_v13, 0.0  ;;  %v468_v12 = vpop.xlane.xlu1 %467  ;;  %v1982_v7 = vadd.f32 %v1840_v33, %v1838_v31 }
 0x115   : > { %v465_v17 = vpop.xlane.xlu0 %464  ;;  %v574_v61 = vsub.f32 %v542_v27, %v1914_v62  ;;  %v528_v52 = vadd.f32 %v468_v12, %v1834_v32  ;;  %v604_v63 = vadd.f32 1e-05, %v588_v59  ;;  %v891_v28 = vadd.f32 %v1848_v37, %v1846_v43 }
 0x116   : > { %v573_v40 = vsub.f32 %v541_v25, %v1918_v53  ;;  %v527_v26 = vadd.f32 %v465_v17, %v1836_v30  ;;  %v603_v22 = vadd.f32 1e-05, %v587_v5  ;;  %v902_v30 = vadd.f32 %v1856_v58, %v1854_v44  ;;  %v1997_v5 = vpop.f32.mrf.mxu0 }
 0x117   : > { %v590_v62 = vmax.f32 %v574_v61, 0.0  ;;  %v544_v53 = vmul.f32 0.0078125, %v528_v52  ;;  %1309 = vrsqrt.f32 %v604_v63  ;;  %v894_v59 = vadd.f32 %v1868_v47, %v1866_v6  ;;  %v2006_v47 = vpop.f32.mrf.mxu1 }
 0x118   : > { %v589_v13 = vmax.f32 %v573_v40, 0.0  ;;  %v543_v27 = vmul.f32 0.0078125, %v527_v26  ;;  %v474_v32 = vpop.xlane.xlu1 %473  ;;  %v1994_v31 = vadd.f32 %v1891_v8, %v1881_v3  ;;  %1311 = vrsqrt.f32 %v603_v22 }
 0x119   : > { %v471_v25 = vpop.xlane.xlu0 %470  ;;  %v606_v33 = vadd.f32 1e-05, %v590_v62  ;;  %v576_v37 = vsub.f32 %v544_v53, %v1924_v2  ;;  %v530_v44 = vadd.f32 %v474_v32, %v1842_v34  ;;  %v2004_v6 = vadd.f32 %v1920_v1, %v1906_v45  ;;  %v2018_v34 = vld [vmem:[%s2203_s3] ss:$0 sm:$0xff] }
 0x11a   : > { %v605_v43 = vadd.f32 1e-05, %v589_v13  ;;  %v575_v12 = vsub.f32 %v543_v27, %v1928_v18  ;;  %v529_v58 = vadd.f32 %v471_v25, %v1844_v42  ;;  %v2010_v8 = vadd.f32 %v1948_v23, %v1938_v20  ;;  %v2026_v13 = vpop.f32.mrf.mxu1 }
 0x11b   : > { %1313 = vrsqrt.f32 %v606_v33  ;;  %v592_v3 = vmax.f32 %v576_v37, 0.0  ;;  %v2012_v2 = vadd.f32 %v909_v51, %v764_v55  ;;  %v546_v45 = vmul.f32 0.0078125, %v530_v44  ;;  %v2022_v51 = vpop.f32.mrf.mxu0 }
 0x11c   : > { %v1302_v17 = vpop.eup %1301  ;;  %1315 = vrsqrt.f32 %v605_v43  ;;  %v591_v42 = vmax.f32 %v575_v12, 0.0  ;;  %v545_v1 = vmul.f32 0.0078125, %v529_v58  ;;  %v480_v18 = vpop.xlane.xlu1 %479 }
 0x11d   : > { %v1304_v61 = vpop.eup %1303  ;;  %v608_v40 = vadd.f32 1e-05, %v592_v3  ;;  %v954_v52 = vmul.f32 %v1302_v17, %v894_v59  ;;  %v970_v23 = vmul.f32 %v1302_v17, %v1862_v54  ;;  %v532_v20 = vadd.f32 %v480_v18, %v1850_v38  ;;  %v477_v55 = vpop.xlane.xlu0 %476 }
 0x11e   : > { %v607_v26 = vadd.f32 1e-05, %v591_v42  ;;  %v953_v63 = vmul.f32 %v1304_v61, %v891_v28  ;;  %v969_v22 = vmul.f32 %v1304_v61, %v1864_v9  ;;  %v578_v62 = vsub.f32 %v546_v45, %v1932_v19  ;;  %v2037_v28 = vld [vmem:[%s2204_s4] ss:$0 sm:$0xff]  ;;  %v2042_v37 = vpop.f32.mrf.mxu0  ;;  %v2046_v42 = vpop.f32.mrf.mxu1 }
 0x11f   : > { %1317 = vrsqrt.f32 %v608_v40  ;;  %v577_v53 = vsub.f32 %v545_v1, %v1936_v11  ;;  %v993_v54 = vmul.f32 %v2018_v34, %v970_v23  ;;  %v548_v38 = vmul.f32 0.0078125, %v532_v20 }
 0x120   : > { %v1306_v27 = vpop.eup %1305  ;;  %1319 = vrsqrt.f32 %v607_v26  ;;  %v992_v9 = vmul.f32 %v2018_v34, %v969_v22  ;;  %v594_v19 = vmax.f32 %v578_v62, 0.0  ;;  %v531_v32 = vadd.f32 %v477_v55, %v1852_v48  ;;  %v486_v17 = vpop.xlane.xlu1 %485 }
 0x121   : > { %v1308_v25 = vpop.eup %1307  ;;  %v956_v59 = vmul.f32 %v1306_v27, %v902_v30  ;;  %v972_v33 = vmul.f32 %v1306_v27, %v1870_v14  ;;  %v593_v11 = vmax.f32 %v577_v53, 0.0  ;;  %v1009_v43 = vsub.f32 %v954_v52, %v993_v54  ;;  %v483_v1 = vpop.xlane.xlu0 %482 }
 0x122   : > { %v955_v12 = vmul.f32 %v1308_v25, %v1982_v7  ;;  %v971_v44 = vmul.f32 %v1308_v25, %v1872_v15  ;;  %v1008_v58 = vsub.f32 %v953_v63, %v992_v9  ;;  %v610_v3 = vadd.f32 1e-05, %v594_v19  ;;  %v2065_v22 = vpop.f32.mrf.mxu0  ;;  %v2067_v62 = vpop.f32.mrf.mxu1 }
 0x123   : > { %v995_v48 = vmul.f32 %v2018_v34, %v972_v33  ;;  %v609_v45 = vadd.f32 1e-05, %v593_v11  ;;  %v1032_v30 = vadd.f32 %v2037_v28, %v1009_v43  ;;  %v580_v14 = vsub.f32 %v548_v38, %v1960_v57 }
 0x124   : > { %v994_v18 = vmul.f32 %v2018_v34, %v971_v44  ;;  %v1031_v7 = vadd.f32 %v2037_v28, %v1008_v58  ;;  %1321 = vrsqrt.f32 %v610_v3  ;;  %v547_v15 = vmul.f32 0.0078125, %v531_v32  ;;  %v1310_v61 = vpop.eup %1309  ;;  %v793_v11 = vpop.f32.mrf.mxu0 }
 0x125   : > { %v1011_v40 = vsub.f32 %v956_v59, %v995_v48  ;;  %1323 = vrsqrt.f32 %v609_v45  ;;  %1048 = vst.msk [vmem:[%s2054_s16 + $0x8] sm:$0xff] %vm262_vm0, %v1032_v30  ;;  %v596_v52 = vmax.f32 %v580_v14, 0.0  ;;  %v534_v23 = vadd.f32 %v486_v17, %v1858_v46  ;;  %v1312_v57 = vpop.eup %1311  ;;  %v938_v43 = vpop.f32.mrf.mxu1 }
 0x126   : > { %v1010_v20 = vsub.f32 %v955_v12, %v994_v18  ;;  %1047 = vst.msk [vmem:[%s2054_s16] sm:$0xff] %vm262_vm0, %v1031_v7  ;;  %v579_v55 = vsub.f32 %v547_v15, %v1964_v24  ;;  %v533_v26 = vadd.f32 %v483_v1, %v1860_v0  ;;  %v923_v63 = vadd.f32 %v2006_v47, %v1997_v5 }
 0x127   : > { %v1034_v53 = vadd.f32 %v2037_v28, %v1011_v40  ;;  %v612_v46 = vadd.f32 1e-05, %v596_v52  ;;  %v973_v54 = vmul.f32 %v1312_v57, %v1885_v36  ;;  %v958_v38 = vmul.f32 %v1310_v61, %v2012_v2  ;;  %v1251_v18 = vpop.f32.mrf.mxu1 }
 0x128   : > { %v1314_v27 = vpop.eup %1313  ;;  %v1033_v24 = vadd.f32 %v2037_v28, %v1010_v20  ;;  %v595_v9 = vmax.f32 %v579_v55, 0.0  ;;  %v550_v0 = vmul.f32 0.0078125, %v534_v23  ;;  %v549_v19 = vmul.f32 0.0078125, %v533_v26 }
 0x129   : > { %v1316_v32 = vpop.eup %1315  ;;  %1050 = vst.msk [vmem:[%s2054_s16 + $0x18] sm:$0xff] %vm262_vm0, %v1034_v53  ;;  %1325 = vrsqrt.f32 %v612_v46  ;;  %v957_v5 = vmul.f32 %v1312_v57, %v2004_v6  ;;  %v996_v47 = vmul.f32 %v2018_v34, %v973_v54  ;;  %v976_v25 = vmul.f32 %v1314_v27, %v1887_v60 }
 0x12a   : > { %1049 = vst.msk [vmem:[%s2054_s16 + $0x10] sm:$0xff] %vm262_vm0, %v1033_v24  ;;  %v975_v36 = vmul.f32 %v1316_v32, %v1889_v10  ;;  %v611_v2 = vadd.f32 1e-05, %v595_v9  ;;  %v582_v59 = vsub.f32 %v550_v0, %v1968_v56  ;;  %v960_v33 = vmul.f32 %v1314_v27, %v2010_v8  ;;  %v941_v27 = vpop.f32.mrf.mxu1  ;;  %v2216_v9 = vld [vmem:[#allocation7_spill] sm:$0xff] }
 0x12b   : > { %v1012_v12 = vsub.f32 %v957_v5, %v996_v47  ;;  %v999_v44 = vmul.f32 %v2018_v34, %v976_v25  ;;  %v581_v6 = vsub.f32 %v549_v19, %v1972_v29  ;;  %v974_v58 = vmul.f32 %v1310_v61, %v1883_v35 }
 0x12c   : > { %v1318_v3 = vpop.eup %1317  ;;  %v959_v60 = vmul.f32 %v1316_v32, %v1994_v31  ;;  %v998_v10 = vmul.f32 %v2018_v34, %v975_v36  ;;  %1327 = vrsqrt.f32 %v611_v2  ;;  %v598_v17 = vmax.f32 %v582_v59, 0.0  ;;  %v1227_v31 = vpop.f32.mrf.mxu0 }
 0x12d   : > { %v1320_v56 = vpop.eup %1319  ;;  %v1035_v8 = vadd.f32 %v2037_v28, %v1012_v12  ;;  %v1015_v48 = vsub.f32 %v960_v33, %v999_v44  ;;  %v597_v45 = vmax.f32 %v581_v6, 0.0  ;;  %v997_v30 = vmul.f32 %v2018_v34, %v974_v58 }
 0x12e   : > { %v1014_v14 = vsub.f32 %v959_v60, %v998_v10  ;;  %v614_v29 = vadd.f32 1e-05, %v598_v17  ;;  %v977_v35 = vmul.f32 %v1320_v56, %v1900_v4  ;;  %v926_v1 = vadd.f32 %v2046_v42, %v2042_v37  ;;  %v2214_v4 = vld [vmem:[#allocation5_spill] sm:$0xff] }
 0x12f   : > { %1051 = vst.msk [vmem:[%s2054_s16 + $0x20] sm:$0xff] %vm262_vm0, %v1035_v8  ;;  %v1038_v7 = vadd.f32 %v2037_v28, %v1015_v48  ;;  %v613_v15 = vadd.f32 1e-05, %v597_v45  ;;  %v1013_v61 = vsub.f32 %v958_v38, %v997_v30  ;;  %v961_v40 = vmul.f32 %v1320_v56, %v923_v63  ;;  %v2215_v63 = vld [vmem:[#allocation6_spill] sm:$0xff]  ;;  %v796_v38 = vpop.f32.mrf.mxu0 }
 0x130   : > { %v1037_v52 = vadd.f32 %v2037_v28, %v1014_v14  ;;  %1329 = vrsqrt.f32 %v614_v29  ;;  %v1000_v23 = vmul.f32 %v2018_v34, %v977_v35  ;;  %v978_v57 = vmul.f32 %v1318_v3, %v2214_v4 }
 0x131   : > { %v1322_v20 = vpop.eup %1321  ;;  %1054 = vst.msk [vmem:[%s2054_s16 + $0x38] sm:$0xff] %vm262_vm0, %v1038_v7  ;;  %1331 = vrsqrt.f32 %v613_v15  ;;  %v1036_v37 = vadd.f32 %v2037_v28, %v1013_v61  ;;  %v934_v42 = vadd.f32 %v2026_v13, %v2022_v51  ;;  %v962_v46 = vmul.f32 %v1318_v3, %v926_v1 }
 0x132   : > { %v1324_v55 = vpop.eup %1323  ;;  %1053 = vst.msk [vmem:[%s2054_s16 + $0x30] sm:$0xff] %vm262_vm0, %v1037_v52  ;;  %v1016_v26 = vsub.f32 %v961_v40, %v1000_v23  ;;  %v980_v53 = vmul.f32 %v1322_v20, %v2215_v63  ;;  %v1001_v54 = vmul.f32 %v2018_v34, %v978_v57  ;;  %v931_v24 = vadd.f32 %v1986_v41, %v1978_v50 }
 0x133   : > { %1052 = vst.msk [vmem:[%s2054_s16 + $0x28] sm:$0xff] %vm262_vm0, %v1036_v37  ;;  %v979_v51 = vmul.f32 %v1324_v55, %v2216_v9  ;;  %v964_v0 = vmul.f32 %v1322_v20, %v934_v42  ;;  %v942_v25 = vadd.f32 %v941_v27, %v796_v38  ;;  %v939_v12 = vadd.f32 %v938_v43, %v793_v11 }
 0x134   : > { %v1039_v13 = vadd.f32 %v2037_v28, %v1016_v26  ;;  %v1003_v19 = vmul.f32 %v2018_v34, %v980_v53  ;;  %v1017_v32 = vsub.f32 %v962_v46, %v1001_v54  ;;  %v963_v5 = vmul.f32 %v1324_v55, %v931_v24 }
 0x135   : > { %v1002_v47 = vmul.f32 %v2018_v34, %v979_v51  ;;  %v950_v48 = vadd.f32 %v1251_v18, %v1227_v31 }
 0x136   : > { %v1326_v36 = vpop.eup %1325  ;;  %1055 = vst.msk [vmem:[%s2054_s16 + $0x40] sm:$0xff] %vm262_vm0, %v1039_v13  ;;  %v1019_v2 = vsub.f32 %v964_v0, %v1003_v19  ;;  %v1040_v50 = vadd.f32 %v2037_v28, %v1017_v32 }
 0x137   : > { %v1018_v41 = vsub.f32 %v963_v5, %v1002_v47  ;;  %v982_v59 = vmul.f32 %v1326_v36, %v1941_v49  ;;  %v966_v58 = vmul.f32 %v1326_v36, %v942_v25 }
 0x138   : > { %v1042_v33 = vadd.f32 %v2037_v28, %v1019_v2  ;;  %1056 = vst.msk [vmem:[%s2054_s16 + $0x48] sm:$0xff] %vm262_vm0, %v1040_v50 }
 0x139   : > { %v1328_v44 = vpop.eup %1327  ;;  %v1041_v6 = vadd.f32 %v2037_v28, %v1018_v41  ;;  %v1005_v3 = vmul.f32 %v2018_v34, %v982_v59 }
 0x13a   : > { %1058 = vst.msk [vmem:[%s2054_s16 + $0x58] sm:$0xff] %vm262_vm0, %v1042_v33  ;;  %v981_v60 = vmul.f32 %v1328_v44, %v1944_v39  ;;  %v965_v49 = vmul.f32 %v1328_v44, %v939_v12  ;;  %v947_v39 = vadd.f32 %v2067_v62, %v2065_v22 }
 0x13b   : > { %1057 = vst.msk [vmem:[%s2054_s16 + $0x50] sm:$0xff] %vm262_vm0, %v1041_v6  ;;  %v1021_v10 = vsub.f32 %v966_v58, %v1005_v3 }
 0x13c   : > { %v1004_v17 = vmul.f32 %v2018_v34, %v981_v60 }
 0x13d   : > { %v1330_v11 = vpop.eup %1329  ;;  %v1044_v43 = vadd.f32 %v2037_v28, %v1021_v10 }
 0x13e   : > { %v1332_v56 = vpop.eup %1331  ;;  %v1020_v8 = vsub.f32 %v965_v49, %v1004_v17  ;;  %v984_v45 = vmul.f32 %v1330_v11, %v1951_v16  ;;  %v968_v29 = vmul.f32 %v1330_v11, %v950_v48 }
 0x13f   : > { %v983_v30 = vmul.f32 %v1332_v56, %v1954_v21  ;;  %1060 = vst.msk [vmem:[%s2054_s16 + $0x68] sm:$0xff] %vm262_vm0, %v1044_v43  ;;  %v967_v1 = vmul.f32 %v1332_v56, %v947_v39 }
 0x140   : > { %v1043_v14 = vadd.f32 %v2037_v28, %v1020_v8  ;;  %v1007_v35 = vmul.f32 %v2018_v34, %v984_v45 }
 0x141   : > { %v1006_v31 = vmul.f32 %v2018_v34, %v983_v30 }
 0x142   : > { %1059 = vst.msk [vmem:[%s2054_s16 + $0x60] sm:$0xff] %vm262_vm0, %v1043_v14  ;;  %v1023_v16 = vsub.f32 %v968_v29, %v1007_v35 }
 0x143   : > { %v1022_v21 = vsub.f32 %v967_v1, %v1006_v31 }
 0x144   : > { %v1046_v22 = vadd.f32 %v2037_v28, %v1023_v16 }
 0x145   : > { %v1045_v34 = vadd.f32 %v2037_v28, %v1022_v21 }
 0x146   : > { %1062 = vst.msk [vmem:[%s2054_s16 + $0x78] sm:$0xff] %vm262_vm0, %v1046_v22 }
 0x147   : > { %1061 = vst.msk [vmem:[%s2054_s16 + $0x70] sm:$0xff] %vm262_vm0, %v1045_v34 }
 0x148   : > { %1346 = shalt.err (!%p1343_p3)
}
 0x149   : > { %s1347_s10 = scalar_lea.hbm %s2149_s6, 2048  ;;  %s1351_s13 = scalar_lea.hbm %s2205_s5, 4096 }
 0x14a   : > { %p1348_p4 = scmp.ne.s32.totalorder %s2149_s6, %s1347_s10  ;;  %p1352_p9 = scmp.lt.s32.totalorder %s2149_s6, %s2205_s5 }
 0x14b   : > { %p1353_p10 = scmp.lt.s32.totalorder %s1351_s13, %s1347_s10 }
 0x14c   : > { %p1349_p7 = pnand %p1348_p4, %p1466_p5 }
 0x14d   : > { %p1354_p11 = por %p1353_p10, %p1352_p9 }
 0x14e   : > { %p1350_p8 = pneg %p1349_p7 }
 0x150   : > { %p1355_p12 = pnand %p1354_p11, %p1350_p8 }
 0x152   : > { %1358 = shalt.err (!%p1355_p12)
}
 0x153   : > { %s1396_s16 = smov 128   ;;  %s1397_s17 = smov 8  }
 0x154   : > { %1252 = dma.vmem_to_hbm [thread:$0]  (%p1466_p5), %s2151_s23, 2048, %s2149_s6, %s2160_s22, %s1396_s16, %s1396_s16, %s1397_s17  }
 0x155 PF: > { %p1258_p13 = scmp.ge.s32.totalorder %s1393_s21, 2  ;;  %s1092_s25 = sand.u32 1, %s1381_s18  }
 0x156   : > { %s1093_s26 = scalar_lea.sflag [#allocation3], %s1092_s25 }
 0x157   : > { %p1255_p0 = pnand %p1258_p13, %p1470_p6 }
 0x159   : > { %p1256_p1 = pneg %p1255_p0 }
 0x15b   : > { %1376 = dma.done.wait (%p1256_p1), %s1093_s26, 2048  }
 0x15c   : > { %1378 = vsyncadd (%p1256_p1), %s1093_s26, 4294965248  ;;  %p15_p2 = scmp.ge.s32.totalorder %s1453_s24, 4   ;;  %s2217_s18 = smov %s1385_s19 }
 0x15d   : > { %s2218_s19 = smov %s1389_s20  ;;  %s2219_s20 = smov %s1464_s27 }
 0x15e   : > { %s2220_s21 = smov %s1453_s24  ;;  %17 = sbr.rel (!%p15_p2) target bundleno = 3 (0x3), region = 75 }
 0x163   :  { %1098 = vsyncpa [#allocation3], 1 }
 0x164   :  { %1100 = vsyncpa [#allocation3 + $0x1], 1 }

</bundles_post_ra>
